<compile_context>
chip_gen: v7x
topology: tpu7x:2x2x1
jax: 0.10.0
libtpu: 0.0.40
codegen_flags: <defaults>
</compile_context>

<pallas_src>
import functools
import math

import jax
import jax.numpy as jnp
from jax import lax
from jax.experimental import pallas as pl
from jax.experimental.pallas import tpu as pltpu


# ----------------------------------------------------------------------------
# pltpu.roll rotation-direction probe (one trivial kernel, cached).
# tpu.dynamic_rotate's direction has not been identical across JAX/Mosaic
# releases; probing once keeps the main kernel correct either way.
# ----------------------------------------------------------------------------
@functools.lru_cache(maxsize=None)
def _roll_matches_jnp_roll() -> bool:
    def probe(x_ref, o_ref):
        o_ref[...] = pltpu.roll(x_ref[...], shift=1, axis=1)

    x = jnp.broadcast_to(jnp.arange(128, dtype=jnp.float32), (8, 128))
    r = pl.pallas_call(probe, out_shape=jax.ShapeDtypeStruct((8, 128), jnp.float32))(x)
    # jnp.roll(x, 1, axis=1)[:, 1] == x[:, 0] == 0.
    return bool(r[0, 1] == 0.0)


_TAP_OFFSETS = tuple((dy, dx) for dy in (-1, 0, 1) for dx in (-1, 0, 1))


# ----------------------------------------------------------------------------
# Fused kernel: single invocation, both branches + whole batch.
# ----------------------------------------------------------------------------
def _decouple_branch_kernel(x_ref, wdt_ref, bd_ref, wtb_ref, bt_ref, mask_ref,
                            o_ref, *, N, H, W, Cout, roll_like_jnp):
    # x_ref:    (N, Cin, H*W)        input, channels on sublanes, H*W on lanes
    # wdt_ref:  (2*Cout, Cin)        [agg; appr] 1x1 weights, pre-transposed
    # bd_ref:   (2*Cout, 1)          1x1 bias
    # wtb_ref:  (2*Cout, 9*2*Cout)   block-diagonal 3x3 weights (taps+branches on K)
    # bt_ref:   (2*Cout, 1)          3x3 bias
    # mask_ref: (9, 1, H*W)          0/1 boundary mask per tap (lane-indexed)
    # o_ref:    (2, N, Cout, H*W)    branch-major, lane-dense output
    HW = H * W

    wdt = wdt_ref[...]
    bd = bd_ref[...]
    wtb = wtb_ref[...]
    bt = bt_ref[...]
    masks = [mask_ref[t] for t in range(9)]           # hoisted (1, H*W) loads

    for n in range(N):                                 # tiny batch -> static unroll
        # 1x1 down-conv for BOTH branches in one dot: (2C, Cin) @ (Cin, HW).
        y = jnp.dot(wdt, x_ref[n], preferred_element_type=jnp.float32) + bd

        # 3x3 conv: 9 lane-shifted, boundary-masked copies of y stacked along K
        # (XLU rolls on vreg-resident data; no padded scratch, no sublane windows),
        # then ONE MXU dot against the block-diagonal tap/branch weight matrix.
        taps = []
        for t, (dy, dx) in enumerate(_TAP_OFFSETS):
            off = dy * W + dx
            if off == 0:
                taps.append(y)
                continue
            shift = (-off) % HW if roll_like_jnp else off % HW
            shifted = pltpu.roll(y, shift=shift, axis=1)
            taps.append(shifted * masks[t])            # wrapped lanes are always masked
        ybig = jnp.concatenate(taps, axis=0)           # (9*2*Cout, HW), aligned sublane concat

        z = jnp.dot(wtb, ybig, preferred_element_type=jnp.float32) + bt
        out = jnp.maximum(z, 0.0)                      # bias + ReLU on 256-lane rows

        o_ref[0, n] = out[:Cout]                       # agg  (Cout, HW), unmasked lane-dense store
        o_ref[1, n] = out[Cout:]                       # appr (Cout, HW)


# ----------------------------------------------------------------------------
# Wrapper (NCHW in, NCHW out — only free reshapes at the boundary)
# ----------------------------------------------------------------------------
def decouple_branch_forward(params, x_nchw):
    N, Cin, H, W = x_nchw.shape
    Cout = params["wd"].shape[-1]
    C2 = 2 * Cout
    HW = H * W

    x = x_nchw.reshape(N, Cin, HW)                     # free reshape, no transpose

    # ---- tiny one-off packing of weights / masks (outside the kernel) ------
    # 1x1 weights of both branches stacked on rows, pre-transposed: (2C, Cin).
    wdt = jnp.transpose(params["wd"], (0, 2, 1)).reshape(C2, Cin)
    bd = params["bd"].reshape(C2, 1)
    # 3x3 weights: block-diagonal over branches, taps stacked on K, so the whole
    # 3x3 stage of BOTH branches is one (2C, 9*2C) @ (9*2C, HW) MXU dot.
    eye2 = jnp.eye(2, dtype=params["wt"].dtype)
    wtb = jnp.einsum("btic,bd->bctdi", params["wt"], eye2).reshape(C2, 9 * C2)
    bt = params["bt"].reshape(C2, 1)
    # 0/1 validity (zero-padding) mask per tap over the flattened H*W lane axis.
    lane = jnp.arange(HW, dtype=jnp.int32)
    hh, ww = lane // W, lane % W
    masks = jnp.stack(
        [((hh + dy >= 0) & (hh + dy < H) & (ww + dx >= 0) & (ww + dx < W))
         for dy, dx in _TAP_OFFSETS]).astype(jnp.float32).reshape(9, 1, HW)

    flops = 2 * N * HW * (C2 * Cin + C2 * 9 * C2)
    bytes_accessed = 4 * (x.size + wdt.size + bd.size + wtb.size + bt.size
                          + masks.size + 2 * N * Cout * HW)

    kernel = functools.partial(_decouple_branch_kernel, N=N, H=H, W=W, Cout=Cout,
                               roll_like_jnp=_roll_matches_jnp_roll())

    vmem = pl.BlockSpec(memory_space=pltpu.MemorySpace.VMEM)   # whole array in VMEM
    out = pl.pallas_call(
        kernel,
        out_shape=jax.ShapeDtypeStruct((2, N, Cout, HW), jnp.float32),
        in_specs=[vmem] * 6,
        out_specs=vmem,
        cost_estimate=pl.CostEstimate(flops=int(flops), transcendentals=0,
                                      bytes_accessed=int(bytes_accessed)),
    )(x, wdt, bd, wtb, bt, masks)

    # TODO(synk): at real FPN sizes (Cout=256, large H*W) add row-block spatial tiling
    #             with a 1-row halo (grid over H) and an explicit vmem_limit_bytes so
    #             the kernel stays inside v7x's 64 MiB VMEM; unnecessary at this size.
    agg = out[0].reshape(N, Cout, H, W)                # free reshapes back to NCHW
    appr = out[1].reshape(N, Cout, H, W)
    return {"agg": agg, "appr": appr}


# ----------------------------------------------------------------------------
# Parameter init (kaiming_normal_ with a=1 for conv weights, zero bias on the
# nn.Conv2d down-convs; small uniform bias on the DFConv2d-approx trans-convs)
# ----------------------------------------------------------------------------
def init_params(seed, cin, cout):
    key = jax.random.PRNGKey(seed)
    kd0, kd1, kt0, kt1, kb = jax.random.split(key, 5)

    def kaiming(k, fan_in, shape):
        std = math.sqrt(2.0 / ((1.0 + 1.0 ** 2) * fan_in))   # a = 1
        return std * jax.random.normal(k, shape, jnp.float32)

    # index 0 = agg branch, index 1 = appr branch
    wd = jnp.stack([kaiming(kd0, cin, (cin, cout)),
                    kaiming(kd1, cin, (cin, cout))])               # (2, Cin, Cout)
    wt = jnp.stack([kaiming(kt0, 9 * cout, (9, cout, cout)),
                    kaiming(kt1, 9 * cout, (9, cout, cout))])      # (2, 9, Cout, Cout)
    bd = jnp.zeros((2, 1, cout), jnp.float32)                      # nn.Conv2d bias -> 0
    bound = 1.0 / math.sqrt(9 * cout)
    bt = jax.random.uniform(kb, (2, 1, cout), jnp.float32,
                            minval=-bound, maxval=bound)           # DFConv2d default-ish bias
    return {"wd": wd, "bd": bd, "wt": wt, "bt": bt}


# ----------------------------------------------------------------------------
# Pure-JAX reference (XLA convolutions) for correctness checking
# ----------------------------------------------------------------------------
def decouple_branch_reference(params, x_nchw):
    outs = []
    for b in range(2):
        wd = params["wd"][b]              # (Cin, Cout)
        bd = params["bd"][b, 0]           # (Cout,)
        wt = params["wt"][b]              # (9, Cout, Cout)
        bt = params["bt"][b, 0]
        cout = wd.shape[1]
        y = jnp.einsum("nchw,cd->ndhw", x_nchw, wd,
                       precision=lax.Precision.HIGHEST) + bd[None, :, None, None]
        w_hwio = wt.reshape(3, 3, cout, cout)              # (kh, kw, cin, cout)
        z = lax.conv_general_dilated(
            y, w_hwio, window_strides=(1, 1), padding=((1, 1), (1, 1)),
            dimension_numbers=("NCHW", "HWIO", "NCHW"),
            precision=lax.Precision.HIGHEST)
        outs.append(jnp.maximum(z + bt[None, :, None, None], 0.0))
    return {"agg": outs[0], "appr": outs[1]}


# ----------------------------------------------------------------------------
# Main
# ----------------------------------------------------------------------------
if __name__ == "__main__":
    N, CIN, COUT, H, W = 2, 16, 32, 16, 16

    x_nchw = jax.random.normal(jax.random.PRNGKey(0), (N, CIN, H, W), jnp.float32)
    params = init_params(seed=42, cin=CIN, cout=COUT)

    out = decouple_branch_forward(params, x_nchw)
    jax.block_until_ready(out["agg"])
    jax.block_until_ready(out["appr"])

    assert out["agg"].shape == (N, COUT, H, W)
    assert out["appr"].shape == (N, COUT, H, W)

    ref = decouple_branch_reference(params, x_nchw)
    # Tolerance covers the possible bf16-pass default MXU precision of either side;
    # with full-f32 matmuls on both paths the observed error is ~1e-6.
    assert jnp.allclose(out["agg"], ref["agg"], atol=1e-2, rtol=1e-2), "agg mismatch"
    assert jnp.allclose(out["appr"], ref["appr"], atol=1e-2, rtol=1e-2), "appr mismatch"

    print("KERNEL_OK")
</pallas_src>

<mosaic_0001>
module attributes {stable_mosaic.version = 11 : i64} {
  func.func @probe(%arg0: memref<8x128xf32, #tpu.memory_space<vmem>>, %arg1: memref<8x128xf32, #tpu.memory_space<vmem>>) attributes {dimension_semantics = [], scalar_prefetch = 0 : i64, scratch_operands = 0 : i64, tpu.core_type = #tpu.core_type<tc>} {
    %c0 = arith.constant 0 : index
    %c0_0 = arith.constant 0 : index
    %0 = vector.load %arg0[%c0, %c0_0] : memref<8x128xf32, #tpu.memory_space<vmem>>, vector<8x128xf32>
    %c1_i32 = arith.constant 1 : i32
    %1 = tpu.dynamic_rotate %0 by %c1_i32 dim 1 : vector<8x128xf32>, i32 -> vector<8x128xf32>
    %c0_1 = arith.constant 0 : index
    %c0_2 = arith.constant 0 : index
    %2 = vector.load %arg1[%c0_1, %c0_2] : memref<8x128xf32, #tpu.memory_space<vmem>>, vector<8x128xf32>
    tpu.vector_store %arg1[%c0_1, %c0_2], %1 {strides = array<i32>} : memref<8x128xf32, #tpu.memory_space<vmem>>, vector<8x128xf32>,
    return
  }
}

</mosaic_0001>

<bundles_post_ra>
// kernel: tpu_custom_call.1
= control target key start
LH: loop header
LB: loop body
LE: loop exit
PB: predicated region body
PF: predicated region fallthrough
CT: control target
= control target key end

     0   :  { %6 = vsyncpa [#allocation3], 0  ;;  %s128_s0 = inlined_call_operand.hbm [shape: f32[8,128], index: 0, kind: input, shape index: {}]   ;;  %s129_s1 = inlined_call_operand.hbm [shape: f32[8,128], index: 1, kind: output, shape index: {}]  }
   0x1   :  { %7 = vsyncpa [#allocation4], 0  ;;  %s91_s6 = smov [#allocation2]   ;;  %s43_s10 = scalar_lea.hbm %s128_s0, 128 }
   0x2   :  { %s14_s7 = sshll.u32 %s91_s6, 4  ;;  %p44_p0 = scmp.ne.s32.totalorder %s128_s0, %s43_s10  ;;  %s15_s7 = int_to_ptr.vmem [resolvable:$true] %s14_s7 }
   0x3   :  { %p47_p1 = scmp.lt.u32.totalorder %s43_s10, %s128_s0 }
   0x5   :  { %p49_p2 = pnand %p47_p1, %p44_p0 }
   0x7   :  { %52 = shalt.err (!%p49_p2)
}
   0x8   :  { %s53_s15 = scalar_lea.vmem %s15_s7, 128  ;;  %p58_p4 = scmp.lt.s32.totalorder %s15_s7, %s15_s7 }
   0x9   :  { %p54_p3 = scmp.ne.s32.totalorder %s15_s7, %s53_s15  ;;  %p59_p5 = scmp.lt.s32.totalorder %s53_s15, %s53_s15 }
   0xb   :  { %p60_p6 = por %p59_p5, %p58_p4 }
   0xd   :  { %p61_p7 = pnand %p60_p6, %p54_p3 }
   0xf   :  { %64 = shalt.err (!%p61_p7)
}
  0x10   :  { %17 = dma.hbm_to_vmem [thread:$0]  %s128_s0, 128, %s15_s7, [#allocation3]  }
  0x11   :  { %87 = dma.done.wait [#allocation3], 128  }
  0x12   :  { %88 = vsyncadd [#allocation3], 4294967168  ;;  %v21_v0 = vld [vmem:[#allocation2] sm:$0xff]  ;;  %s92_s18 = smov 1   ;;  %s93_s19 = smov [#allocation5]  }
  0x13   :  { %22 = vrot.lane.b32.xlu0 %v21_v0, %s92_s18  ;;  %s31_s20 = sshll.u32 %s93_s19, 4  ;;  %s32_s20 = int_to_ptr.vmem [resolvable:$true] %s31_s20 }
  0x14   :  { %s65_s21 = scalar_lea.vmem %s32_s20, 128  ;;  %p70_p9 = scmp.lt.s32.totalorder %s32_s20, %s32_s20 }
  0x15   :  { %p66_p8 = scmp.ne.s32.totalorder %s32_s20, %s65_s21  ;;  %p71_p10 = scmp.lt.s32.totalorder %s65_s21, %s65_s21 }
  0x17   :  { %p72_p11 = por %p71_p10, %p70_p9 }
  0x19   :  { %p73_p12 = pnand %p72_p11, %p66_p8 }
  0x85   :  { %v23_v1 = vpop.permute.xlu0 %22 }
  0x86   :  { %24 = vst [vmem:[#allocation5] sm:$0xff] %v23_v1 }
  0x87   :  { %76 = shalt.err (!%p73_p12)
}
  0x88   :  { %s77_s0 = scalar_lea.hbm %s129_s1, 128 }
  0x89   :  { %p78_p13 = scmp.ne.s32.totalorder %s129_s1, %s77_s0  ;;  %p81_p0 = scmp.lt.u32.totalorder %s77_s0, %s129_s1 }
  0x8b   :  { %p83_p1 = pnand %p81_p0, %p78_p13 }
  0x8d   :  { %86 = shalt.err (!%p83_p1)
}
  0x8e   :  { %34 = dma.vmem_to_hbm [thread:$0]  %s32_s20, 128, %s129_s1, [#allocation4]  }
  0x8f   :  { %89 = dma.done.wait [#allocation4], 128  }
  0x90   :  { %90 = vsyncadd [#allocation4], 4294967168 }
  0x91   :  { %38 = vsyncpa [#allocation3], 1 }
  0x92   :  { %39 = vsyncpa [#allocation4], 1 }

</bundles_post_ra>
